<compile_context>
chip_gen: v7x
topology: tpu7x:2x2x1
jax: 0.10.0
libtpu: 0.0.40
codegen_flags: <defaults>
</compile_context>

<pallas_src>
import jax
import jax.numpy as jnp
from jax.experimental import pallas as pl
from jax.experimental.pallas import tpu as pltpu

LANE = 128
SUBLANE = 8


def _round_up(n, m):
    return ((n + m - 1) // m) * m


def _cdiv(a, b):
    return -(-a // b)


def wholefish_kernel(x_ref,
                     w1_ref, b1_ref,
                     w2_ref, b2_ref,
                     w3_ref, b3_ref,
                     o_ref):
    # Featurizer layer 1: Linear -> Dropout(p=0) -> ReLU
    h = jnp.dot(x_ref[...], w1_ref[...],
                preferred_element_type=jnp.float32) + b1_ref[...]
    h = jnp.maximum(h, 0.0)

    # Featurizer hidden layer: Linear -> Dropout(p=0) -> ReLU
    h = jnp.dot(h, w2_ref[...],
                preferred_element_type=jnp.float32) + b2_ref[...]
    h = jnp.maximum(h, 0.0)

    # Fused (featurizer output Linear) o (linear classifier): single matmul with
    # pre-fused weights/bias, computed at full 128-lane width.
    logits = jnp.dot(h, w3_ref[...],
                     preferred_element_type=jnp.float32) + b3_ref[...]   # (TB, 128)

    # Transposed store: (TB,128) -> (128,TB) goes through the XLU (idle slot here,
    # and both dims are native-tile multiples), then keep only the sublane-padded
    # class rows. Final vst is lane-dense over the batch -> ~8x less HBM writeback.
    logits_t = logits.T                                                  # (128, TB)
    o_ref[...] = logits_t[:o_ref.shape[0], :].astype(o_ref.dtype)        # (C_sub, TB)


def wholefish_forward_padded(x, params, *, batch_tile=2048, out_dtype=jnp.float32):
    """Preferred entry point.

    Returns `(logits_t, num_classes, B)` where `logits_t` has shape
    (round_up(num_classes, 8), B_pad): classes on the sublane axis (rows
    num_classes.. are exactly 0), batch on the lane axis (columns B.. are
    padding garbage). Consumers should fold `logits_t[:num_classes, :B].T`
    into their first op instead of materializing the compact array.
    """
    B, n_inputs = x.shape
    W = params["w_in"].shape[1]
    num_classes = params["w_c"].shape[1]

    # --- algebraic fusion of the two activation-free linears (once, outside the kernel)
    #   (h @ w_out + b_out) @ w_c + b_c == h @ (w_out @ w_c) + (b_out @ w_c + b_c)
    w_fused = params["w_out"] @ params["w_c"]
    b_fused = params["b_out"] @ params["w_c"] + params["b_c"]

    # Matmul runs at 128-lane width (keeps the in-kernel transpose on native tile
    # shapes); only the sublane-padded class rows are stored.
    C_mxu = _round_up(num_classes, LANE)      # 128 for num_classes=10
    C_sub = _round_up(num_classes, SUBLANE)   # 16  for num_classes=10
    w3 = jnp.zeros((W, C_mxu), jnp.float32).at[:, :num_classes].set(w_fused)
    b3 = jnp.zeros((1, C_mxu), jnp.float32).at[:, :num_classes].set(b_fused)

    # --- batch tiling: batch rides the output lane axis, so TB is a multiple of 128.
    # Pick the number of grid steps first (>= 2 whenever the batch spans >= 2 lane
    # tiles, so v7x can shard the parallel axis over both TensorCores), then derive
    # TB; this also keeps batch padding below one extra tile.
    batch_tile = max(LANE, _round_up(batch_tile, LANE))
    B_lane = _round_up(B, LANE)
    n_lane_tiles = B_lane // LANE
    max_tiles_per_step = batch_tile // LANE
    min_steps = 2 if n_lane_tiles >= 2 else 1
    n_steps = max(min_steps, _cdiv(n_lane_tiles, max_tiles_per_step))
    TB = _cdiv(n_lane_tiles, n_steps) * LANE
    B_pad = n_steps * TB
    if B_pad != B:
        x = jnp.pad(x, ((0, B_pad - B), (0, 0)))
    grid = (n_steps,)

    w1, b1 = params["w_in"], params["b_in"]
    w2, b2 = params["w_h"], params["b_h"]

    out_t = pl.pallas_call(
        wholefish_kernel,
        out_shape=jax.ShapeDtypeStruct((C_sub, B_pad), out_dtype),
        grid=grid,
        in_specs=[
            pl.BlockSpec((TB, n_inputs), lambda i: (i, 0)),   # x: tiled over batch
            # Weights/biases: constant index_map -> fetched once, VMEM-resident.
            pl.BlockSpec(w1.shape, lambda i: (0, 0)),
            pl.BlockSpec(b1.shape, lambda i: (0, 0)),
            pl.BlockSpec(w2.shape, lambda i: (0, 0)),
            pl.BlockSpec(b2.shape, lambda i: (0, 0)),
            pl.BlockSpec(w3.shape, lambda i: (0, 0)),
            pl.BlockSpec(b3.shape, lambda i: (0, 0)),
        ],
        out_specs=pl.BlockSpec((C_sub, TB), lambda i: (0, i)),
        compiler_params=pltpu.CompilerParams(
            dimension_semantics=("parallel",),                # v7x: shard batch over 2 TCs
        ),
    )(x, w1, b1, w2, b2, w3, b3)

    return out_t, num_classes, B


def wholefish_forward(x, params, *, batch_tile=2048, out_dtype=jnp.float32):
    """Compact (B, num_classes) logits, matching the PyTorch module's forward().

    The final slice+transpose is a small XLA copy over a 16-sublane slab; for
    maximum efficiency use wholefish_forward_padded and consume the slab directly.
    """
    out_t, num_classes, B = wholefish_forward_padded(
        x, params, batch_tile=batch_tile, out_dtype=out_dtype)
    return out_t[:num_classes, :B].T


def init_params(key, n_inputs, mlp_width, num_classes):
    """Deterministic init. Weights kept as [in, out] (transposed PyTorch layout)."""
    ks = jax.random.split(key, 8)

    def lin(kw, kb, fan_in, fan_out):
        # uniform(-1/sqrt(fan_in), 1/sqrt(fan_in)) like torch.nn.Linear default
        bound = 1.0 / jnp.sqrt(jnp.float32(fan_in))
        w = jax.random.uniform(kw, (fan_in, fan_out), jnp.float32, -bound, bound)
        b = jax.random.uniform(kb, (1, fan_out), jnp.float32, -bound, bound)
        return w, b

    w_in, b_in = lin(ks[0], ks[1], n_inputs, mlp_width)
    w_h, b_h = lin(ks[2], ks[3], mlp_width, mlp_width)
    w_out, b_out = lin(ks[4], ks[5], mlp_width, mlp_width)
    w_c, b_c = lin(ks[6], ks[7], mlp_width, num_classes)
    return dict(w_in=w_in, b_in=b_in, w_h=w_h, b_h=b_h,
                w_out=w_out, b_out=b_out, w_c=w_c, b_c=b_c)


def reference_forward(x, p):
    h = jnp.maximum(x @ p["w_in"] + p["b_in"], 0.0)
    h = jnp.maximum(h @ p["w_h"] + p["b_h"], 0.0)
    h = h @ p["w_out"] + p["b_out"]
    return h @ p["w_c"] + p["b_c"]


if __name__ == "__main__":
    B, n_inputs, mlp_width, num_classes = 8, 32, 32, 10

    key = jax.random.PRNGKey(0)
    kx, kp = jax.random.split(key)
    x = jax.random.normal(kx, (B, n_inputs), jnp.float32)
    params = init_params(kp, n_inputs, mlp_width, num_classes)

    out = jax.block_until_ready(wholefish_forward(x, params))
    ref = reference_forward(x, params)
    assert out.shape == (B, num_classes)
    # w_out@w_c fusion changes rounding slightly vs. the unfused reference.
    assert jnp.allclose(out, ref, atol=1e-4, rtol=1e-4)

    # Exercise batch padding + a multi-step (pipelined, "parallel") grid: B=200
    # -> 2 grid steps of TB=128, transposed/sublane-padded output slab.
    B2 = 200
    x2 = jax.random.normal(jax.random.PRNGKey(1), (B2, n_inputs), jnp.float32)
    out2 = jax.block_until_ready(wholefish_forward(x2, params))
    ref2 = reference_forward(x2, params)
    assert out2.shape == (B2, num_classes)
    assert jnp.allclose(out2, ref2, atol=1e-4, rtol=1e-4)

    # Padded entry point: class rows beyond num_classes are exactly zero.
    slab, nc, b2 = jax.block_until_ready(wholefish_forward_padded(x2, params))
    assert slab.shape[1] % 128 == 0 and slab.shape[0] % 8 == 0
    assert jnp.allclose(slab[:nc, :b2].T, ref2, atol=1e-4, rtol=1e-4)
    assert jnp.all(slab[nc:, :] == 0.0)

    # TODO(synk): dropout uses p=0.0 (identity); stochastic dropout would need pltpu.prng_*.
    print("KERNEL_OK")
</pallas_src>

<mosaic_0001>
module attributes {stable_mosaic.version = 11 : i64} {
  func.func @wholefish_kernel(%arg0: i32, %arg1: memref<128x32xf32, #tpu.memory_space<vmem>>, %arg2: memref<32x32xf32, #tpu.memory_space<vmem>>, %arg3: memref<1x32xf32, #tpu.memory_space<vmem>>, %arg4: memref<32x32xf32, #tpu.memory_space<vmem>>, %arg5: memref<1x32xf32, #tpu.memory_space<vmem>>, %arg6: memref<32x128xf32, #tpu.memory_space<vmem>>, %arg7: memref<1x128xf32, #tpu.memory_space<vmem>>, %arg8: memref<16x128xf32, #tpu.memory_space<vmem>>) attributes {dimension_semantics = [#tpu.dimension_semantics<parallel>], iteration_bounds = array<i64: 1>, scalar_prefetch = 0 : i64, scratch_operands = 0 : i64, tpu.core_type = #tpu.core_type<tc>, window_params = [{transform_indices = @transform_0, window_bounds = array<i64: 128, 32>}, {pipeline_mode = #tpu.pipeline_mode<synchronous>, transform_indices = @transform_1, window_bounds = array<i64: 32, 32>}, {pipeline_mode = #tpu.pipeline_mode<synchronous>, transform_indices = @transform_2, window_bounds = array<i64: 1, 32>}, {pipeline_mode = #tpu.pipeline_mode<synchronous>, transform_indices = @transform_3, window_bounds = array<i64: 32, 32>}, {pipeline_mode = #tpu.pipeline_mode<synchronous>, transform_indices = @transform_4, window_bounds = array<i64: 1, 32>}, {pipeline_mode = #tpu.pipeline_mode<synchronous>, transform_indices = @transform_5, window_bounds = array<i64: 32, 128>}, {pipeline_mode = #tpu.pipeline_mode<synchronous>, transform_indices = @transform_6, window_bounds = array<i64: 1, 128>}, {transform_indices = @transform_7, window_bounds = array<i64: 16, 128>}]} {
    %c0 = arith.constant 0 : index
    %c0_0 = arith.constant 0 : index
    %0 = vector.load %arg1[%c0, %c0_0] : memref<128x32xf32, #tpu.memory_space<vmem>>, vector<128x32xf32>
    %c0_1 = arith.constant 0 : index
    %c0_2 = arith.constant 0 : index
    %1 = vector.load %arg2[%c0_1, %c0_2] : memref<32x32xf32, #tpu.memory_space<vmem>>, vector<32x32xf32>
    %cst = arith.constant dense<0.000000e+00> : vector<128x32xf32>
    %2 = tpu.matmul %0, %1, %cst {dimension_numbers = #tpu.dot_dimension_numbers<[1], [0], [0], [1], [0, 0, 1, 1], [], []>} : vector<128x32xf32>, vector<32x32xf32>, vector<128x32xf32> -> vector<128x32xf32>
    %c0_3 = arith.constant 0 : index
    %c0_4 = arith.constant 0 : index
    %3 = vector.load %arg3[%c0_3, %c0_4] : memref<1x32xf32, #tpu.memory_space<vmem>>, vector<1x32xf32>
    %4 = vector.broadcast %3 : vector<1x32xf32> to vector<128x32xf32>
    %5 = arith.addf %2, %4 : vector<128x32xf32>
    %cst_5 = arith.constant 0.000000e+00 : f32
    %6 = vector.broadcast %cst_5 : f32 to vector<128x32xf32>
    %7 = arith.maximumf %5, %6 : vector<128x32xf32>
    %c0_6 = arith.constant 0 : index
    %c0_7 = arith.constant 0 : index
    %8 = vector.load %arg4[%c0_6, %c0_7] : memref<32x32xf32, #tpu.memory_space<vmem>>, vector<32x32xf32>
    %cst_8 = arith.constant dense<0.000000e+00> : vector<128x32xf32>
    %9 = tpu.matmul %7, %8, %cst_8 {dimension_numbers = #tpu.dot_dimension_numbers<[1], [0], [0], [1], [0, 0, 1, 1], [], []>} : vector<128x32xf32>, vector<32x32xf32>, vector<128x32xf32> -> vector<128x32xf32>
    %c0_9 = arith.constant 0 : index
    %c0_10 = arith.constant 0 : index
    %10 = vector.load %arg5[%c0_9, %c0_10] : memref<1x32xf32, #tpu.memory_space<vmem>>, vector<1x32xf32>
    %11 = vector.broadcast %10 : vector<1x32xf32> to vector<128x32xf32>
    %12 = arith.addf %9, %11 : vector<128x32xf32>
    %cst_11 = arith.constant 0.000000e+00 : f32
    %13 = vector.broadcast %cst_11 : f32 to vector<128x32xf32>
    %14 = arith.maximumf %12, %13 : vector<128x32xf32>
    %c0_12 = arith.constant 0 : index
    %c0_13 = arith.constant 0 : index
    %15 = vector.load %arg6[%c0_12, %c0_13] : memref<32x128xf32, #tpu.memory_space<vmem>>, vector<32x128xf32>
    %cst_14 = arith.constant dense<0.000000e+00> : vector<128x128xf32>
    %16 = tpu.matmul %14, %15, %cst_14 {dimension_numbers = #tpu.dot_dimension_numbers<[1], [0], [0], [1], [0, 0, 1, 1], [], []>} : vector<128x32xf32>, vector<32x128xf32>, vector<128x128xf32> -> vector<128x128xf32>
    %c0_15 = arith.constant 0 : index
    %c0_16 = arith.constant 0 : index
    %17 = vector.load %arg7[%c0_15, %c0_16] : memref<1x128xf32, #tpu.memory_space<vmem>>, vector<1x128xf32>
    %18 = vector.broadcast %17 : vector<1x128xf32> to vector<128x128xf32>
    %19 = arith.addf %16, %18 : vector<128x128xf32>
    %20 = tpu.transpose %19, [1, 0] : vector<128x128xf32> -> vector<128x128xf32>
    %21 = vector.extract_strided_slice %20 {offsets = [0, 0], sizes = [16, 128], strides = [1, 1]} : vector<128x128xf32> to vector<16x128xf32>
    %c0_17 = arith.constant 0 : index
    %c0_18 = arith.constant 0 : index
    %22 = vector.load %arg8[%c0_17, %c0_18] : memref<16x128xf32, #tpu.memory_space<vmem>>, vector<16x128xf32>
    tpu.vector_store %arg8[%c0_17, %c0_18], %21 {strides = array<i32>} : memref<16x128xf32, #tpu.memory_space<vmem>>, vector<16x128xf32>,
    return
  }
  func.func @transform_0(%arg0: i32) -> (i32, i32) {
    %c0_i32 = arith.constant 0 : i32
    %c0_i32_0 = arith.constant 0 : i32
    return %arg0, %c0_i32 : i32, i32
  }
  func.func @transform_1(%arg0: i32) -> (i32, i32) {
    %c0_i32 = arith.constant 0 : i32
    %c0_i32_0 = arith.constant 0 : i32
    %c0_i32_1 = arith.constant 0 : i32
    return %c0_i32, %c0_i32_0 : i32, i32
  }
  func.func @transform_2(%arg0: i32) -> (i32, i32) {
    %c0_i32 = arith.constant 0 : i32
    %c0_i32_0 = arith.constant 0 : i32
    %c0_i32_1 = arith.constant 0 : i32
    return %c0_i32, %c0_i32_0 : i32, i32
  }
  func.func @transform_3(%arg0: i32) -> (i32, i32) {
    %c0_i32 = arith.constant 0 : i32
    %c0_i32_0 = arith.constant 0 : i32
    %c0_i32_1 = arith.constant 0 : i32
    return %c0_i32, %c0_i32_0 : i32, i32
  }
  func.func @transform_4(%arg0: i32) -> (i32, i32) {
    %c0_i32 = arith.constant 0 : i32
    %c0_i32_0 = arith.constant 0 : i32
    %c0_i32_1 = arith.constant 0 : i32
    return %c0_i32, %c0_i32_0 : i32, i32
  }
  func.func @transform_5(%arg0: i32) -> (i32, i32) {
    %c0_i32 = arith.constant 0 : i32
    %c0_i32_0 = arith.constant 0 : i32
    %c0_i32_1 = arith.constant 0 : i32
    return %c0_i32, %c0_i32_0 : i32, i32
  }
  func.func @transform_6(%arg0: i32) -> (i32, i32) {
    %c0_i32 = arith.constant 0 : i32
    %c0_i32_0 = arith.constant 0 : i32
    %c0_i32_1 = arith.constant 0 : i32
    return %c0_i32, %c0_i32_0 : i32, i32
  }
  func.func @transform_7(%arg0: i32) -> (i32, i32) {
    %c0_i32 = arith.constant 0 : i32
    %c0_i32_0 = arith.constant 0 : i32
    return %c0_i32, %arg0 : i32, i32
  }
}

</mosaic_0001>

<bundles_post_ra>
// kernel: tpu_custom_call.1
= control target key start
LH: loop header
LB: loop body
LE: loop exit
PB: predicated region body
PF: predicated region fallthrough
CT: control target
= control target key end

     0   :  { %vm54_vm0 = vcmask 261120   ;;  %s1196_s0 = inlined_call_operand.vmem [shape: f32[128,32], index: 0, kind: input, shape index: {}]   ;;  %s1197_s1 = inlined_call_operand.vmem [shape: f32[32,32], index: 1, kind: input, shape index: {}]   ;;  %s1198_s2 = inlined_call_operand.vmem [shape: f32[1,32], index: 2, kind: input, shape index: {}]   ;;  %s1199_s3 = inlined_call_operand.vmem [shape: f32[32,32], index: 3, kind: input, shape index: {}]   ;;  %s1200_s4 = inlined_call_operand.vmem [shape: f32[1,32], index: 4, kind: input, shape index: {}]   ;;  %s1201_s5 = inlined_call_operand.vmem [shape: f32[32,128], index: 5, kind: input, shape index: {}]   ;;  %s1202_s6 = inlined_call_operand.vmem [shape: f32[1,128], index: 6, kind: input, shape index: {}]   ;;  %s1203_s7 = inlined_call_operand.hbm [shape: f32[16,128], index: 7, kind: output, shape index: {}]  }
   0x1   :  { %v43_v0 = vld [vmem:[%s1197_s1] sm:$0xff]  ;;  %v44_v1 = vld [vmem:[%s1197_s1 + $0x8] sm:$0xff]  ;;  %v45_v2 = vld [vmem:[%s1197_s1 + $0x10] sm:$0xff] }
   0x2   :  { %v945_v3 = vpack.c.bf16 %v44_v1, %v43_v0  ;;  %v46_v4 = vld [vmem:[%s1197_s1 + $0x18] sm:$0xff]  ;;  %v27_v5 = vld [vmem:[%s1196_s0] sm:$0xff]  ;;  %v265_v9 = vld [vmem:[%s1199_s3 + $0x8] sm:$0xff] }
   0x3   :  { %v949_v6 = vpack.c.bf16 %v46_v4, %v45_v2  ;;  %857 = vmatprep.mubr.msk.f32.mxu0 %vm54_vm0, %v27_v5  ;;  %v35_v7 = vld [vmem:[%s1196_s0 + $0x40] sm:$0xff]  ;;  %v266_v10 = vld [vmem:[%s1199_s3 + $0x10] sm:$0xff]  ;;  %v267_v11 = vld [vmem:[%s1199_s3 + $0x18] sm:$0xff] }
   0x4   :  { %946 = vmatprep.subr.bf16.mxu0 %v945_v3  ;;  %969 = vmatprep.subr.bf16.mxu1 %v945_v3  ;;  %v264_v8 = vld [vmem:[%s1199_s3] sm:$0xff]  ;;  %v28_v12 = vld [vmem:[%s1196_s0 + $0x8] sm:$0xff] }
   0x5   :  { %948 = vmatpush3.bf16.msra.mxu0 %v945_v3  ;;  %971 = vmatpush3.bf16.msra.mxu1 %v945_v3  ;;  %v36_v13 = vld [vmem:[%s1196_s0 + $0x48] sm:$0xff]  ;;  %v953_v14 = vpack.c.bf16 %v265_v9, %v264_v8 }
   0x6   :  { %950 = vmatprep.subr.bf16.mxu0 %v949_v6  ;;  %970 = vmatprep.subr.bf16.mxu1 %v949_v6 }
   0x7   :  { %869 = vmatprep.mubr.msk.f32.mxu1 %vm54_vm0, %v35_v7 }
   0x9   :  { %952 = vmatpush3.bf16.msra.mxu0 %v949_v6  ;;  %972 = vmatpush3.bf16.msra.mxu1 %v949_v6 }
   0xa   :  { %12 = vsyncpa [#allocation3], 0  ;;  %v29_v15 = vld [vmem:[%s1196_s0 + $0x10] sm:$0xff]  ;;  %954 = vmatprep.subr.bf16.mxu1 %v953_v14  ;;  %v957_v17 = vpack.c.bf16 %v267_v11, %v266_v10  ;;  %v30_v18 = vld [vmem:[%s1196_s0 + $0x18] sm:$0xff] }
   0xb   :  { %v37_v16 = vld [vmem:[%s1196_s0 + $0x50] sm:$0xff]  ;;  %v38_v19 = vld [vmem:[%s1196_s0 + $0x58] sm:$0xff]  ;;  %v31_v20 = vld [vmem:[%s1196_s0 + $0x20] sm:$0xff] }
   0xc   :  { %858 = vmatmul.mubr.msk.f32.vlgmr.msra.gmra.mrb[0].mxu0 %vm54_vm0, %v28_v12  ;;  %870 = vmatmul.mubr.msk.f32.vlgmr.msra.gmra.mrb[0].mxu1 %vm54_vm0, %v36_v13  ;;  %v39_v21 = vld [vmem:[%s1196_s0 + $0x60] sm:$0xff]  ;;  %v32_v22 = vld [vmem:[%s1196_s0 + $0x28] sm:$0xff]  ;;  %v33_v24 = vld [vmem:[%s1196_s0 + $0x30] sm:$0xff] }
   0xd   :  { %860 = vmatprep.mubr.msk.f32.mxu0 %vm54_vm0, %v29_v15  ;;  %872 = vmatprep.mubr.msk.f32.mxu1 %vm54_vm0, %v37_v16  ;;  %v40_v23 = vld [vmem:[%s1196_s0 + $0x68] sm:$0xff]  ;;  %v41_v25 = vld [vmem:[%s1196_s0 + $0x70] sm:$0xff]  ;;  %v34_v26 = vld [vmem:[%s1196_s0 + $0x38] sm:$0xff] }
   0xe   :  { %956 = vmatpush3.bf16.msra.mxu1 %v953_v14  ;;  %v42_v27 = vld [vmem:[%s1196_s0 + $0x78] sm:$0xff]  ;;  %v484_v28 = vld [vmem:[%s1201_s5] sm:$0xff]  ;;  %v485_v29 = vld [vmem:[%s1201_s5 + $0x8] sm:$0xff] }
   0xf   :  { %958 = vmatprep.subr.bf16.mxu1 %v957_v17  ;;  %v486_v30 = vld [vmem:[%s1201_s5 + $0x10] sm:$0xff]  ;;  %v961_v31 = vpack.c.bf16 %v485_v29, %v484_v28  ;;  %v487_v32 = vld [vmem:[%s1201_s5 + $0x18] sm:$0xff]  ;;  %v738_v34 = vld [vmem:[%s1198_s2] ss:$0 sm:$0xff] }
  0x10   :  { %861 = vmatmul.mubr.msk.f32.gmra.mrb[2].mxu0 %vm54_vm0, %v30_v18  ;;  %873 = vmatmul.mubr.msk.f32.gmra.mrb[2].mxu1 %vm54_vm0, %v38_v19  ;;  %v965_v33 = vpack.c.bf16 %v487_v32, %v486_v30  ;;  %v755_v19 = vld [vmem:[%s1200_s4] ss:$0 sm:$0xff] }
  0x11   :  { %863 = vmatprep.mubr.msk.f32.mxu0 %vm54_vm0, %v31_v20  ;;  %875 = vmatprep.mubr.msk.f32.mxu1 %vm54_vm0, %v39_v21 }
  0x12   :  { %960 = vmatpush3.bf16.msra.mxu1 %v957_v17  ;;  %962 = vmatprep.subr.bf16.mxu0 %v961_v31 }
  0x13   :  { %964 = vmatpush3.bf16.msra.mxu0 %v961_v31 }
  0x14   :  { %864 = vmatmul.mubr.msk.f32.gmra.mrb[4].mxu0 %vm54_vm0, %v32_v22  ;;  %876 = vmatmul.mubr.msk.f32.gmra.mrb[4].mxu1 %vm54_vm0, %v40_v23 }
  0x15   :  { %866 = vmatprep.mubr.msk.f32.mxu0 %vm54_vm0, %v33_v24  ;;  %878 = vmatprep.mubr.msk.f32.mxu1 %vm54_vm0, %v41_v25 }
  0x16   :  { %966 = vmatprep.subr.bf16.mxu0 %v965_v33 }
  0x17   :  { %968 = vmatpush3.bf16.msra.mxu0 %v965_v33 }
  0x18   :  { %867 = vmatmul.mubr.msk.f32.gmra.mrb[6].mxu0 %vm54_vm0, %v34_v26  ;;  %879 = vmatmul.mubr.msk.f32.gmra.mrb[6].mxu1 %vm54_vm0, %v42_v27 }
  0xdf   :  { %v859_v35 = vpop.f32.mrb[0].mxu0  ;;  %v871_v36 = vpop.f32.mrb[0].mxu1 }
  0xe0   :  { %v175_v37 = vadd.f32 %v859_v35, %v738_v34  ;;  %v169_v38 = vpop.f32.mrb[1].mxu0  ;;  %v209_v39 = vpop.f32.mrb[1].mxu1  ;;  %v215_v3 = vadd.f32 %v871_v36, %v738_v34 }
  0xe1   :  { %v170_v40 = vadd.f32 %v738_v34, %v169_v38  ;;  %v210_v60 = vadd.f32 %v738_v34, %v209_v39 }
  0xe2   :  { %v249_v44 = vmax.f32 %v175_v37, 0.0  ;;  %v257_v7 = vmax.f32 %v215_v3, 0.0 }
  0xe3   :  { %v248_v41 = vmax.f32 %v170_v40, 0.0  ;;  %v862_v42 = vpop.f32.mrb[2].mxu0  ;;  %v874_v43 = vpop.f32.mrb[2].mxu1  ;;  %v256_v5 = vmax.f32 %v210_v60, 0.0 }
  0xe4   :  { %v185_v45 = vadd.f32 %v862_v42, %v738_v34  ;;  %v179_v46 = vpop.f32.mrb[3].mxu0  ;;  %v219_v47 = vpop.f32.mrb[3].mxu1  ;;  %v225_v8 = vadd.f32 %v874_v43, %v738_v34 }
  0xe5   :  { %v180_v48 = vadd.f32 %v738_v34, %v179_v46  ;;  %889 = vmatprep.mubr.msk.f32.mxu1 %vm54_vm0, %v248_v41  ;;  %v220_v6 = vadd.f32 %v738_v34, %v219_v47 }
  0xe6   :  { %v251_v49 = vmax.f32 %v185_v45, 0.0  ;;  %890 = vmatmul.mubr.msk.f32.vlgmr.msra.gmra.mrb[8].mxu1 %vm54_vm0, %v249_v44  ;;  %v259_v11 = vmax.f32 %v225_v8, 0.0 }
  0xe7   :  { %v250_v50 = vmax.f32 %v180_v48, 0.0  ;;  %v865_v51 = vpop.f32.mrb[4].mxu0  ;;  %v877_v52 = vpop.f32.mrb[4].mxu1  ;;  %v258_v9 = vmax.f32 %v220_v6, 0.0 }
  0xe8   :  { %v195_v53 = vadd.f32 %v865_v51, %v738_v34  ;;  %v189_v54 = vpop.f32.mrb[5].mxu0  ;;  %v229_v55 = vpop.f32.mrb[5].mxu1  ;;  %v235_v12 = vadd.f32 %v877_v52, %v738_v34 }
  0xe9   :  { %892 = vmatprep.mubr.msk.f32.mxu1 %vm54_vm0, %v250_v50  ;;  %v190_v56 = vadd.f32 %v738_v34, %v189_v54  ;;  %v230_v10 = vadd.f32 %v738_v34, %v229_v55 }
  0xea   :  { %v253_v57 = vmax.f32 %v195_v53, 0.0  ;;  %893 = vmatmul.mubr.msk.f32.gmra.mrb[10].mxu1 %vm54_vm0, %v251_v49  ;;  %v261_v15 = vmax.f32 %v235_v12, 0.0 }
  0xeb   :  { %v252_v58 = vmax.f32 %v190_v56, 0.0  ;;  %v868_v59 = vpop.f32.mrb[6].mxu0  ;;  %v880_v61 = vpop.f32.mrb[6].mxu1  ;;  %v260_v13 = vmax.f32 %v230_v10, 0.0 }
  0xec   :  { %v205_v62 = vadd.f32 %v868_v59, %v738_v34  ;;  %v199_v63 = vpop.f32.mrb[7].mxu0  ;;  %v239_v0 = vpop.f32.mrb[7].mxu1  ;;  %v245_v16 = vadd.f32 %v880_v61, %v738_v34 }
  0xed   :  { %895 = vmatprep.mubr.msk.f32.mxu1 %vm54_vm0, %v252_v58  ;;  %v200_v1 = vadd.f32 %v738_v34, %v199_v63  ;;  %v240_v14 = vadd.f32 %v738_v34, %v239_v0 }
  0xee   :  { %896 = vmatmul.mubr.msk.f32.gmra.mrb[12].mxu1 %vm54_vm0, %v253_v57  ;;  %v255_v2 = vmax.f32 %v205_v62, 0.0  ;;  %v263_v18 = vmax.f32 %v245_v16, 0.0 }
  0xef   :  { %v254_v4 = vmax.f32 %v200_v1, 0.0  ;;  %v262_v17 = vmax.f32 %v240_v14, 0.0 }
  0xf1   :  { %898 = vmatprep.mubr.msk.f32.mxu1 %vm54_vm0, %v254_v4  ;;  %v772_v4 = vld [vmem:[%s1202_s6] ss:$0 sm:$0xff]  ;;  %s1000_s6 = smov [#allocation2]  }
  0xf2   :  { %899 = vmatmul.mubr.msk.f32.gmra.mrb[14].mxu1 %vm54_vm0, %v255_v2  ;;  %s727_s9 = sshll.u32 %s1000_s6, 4  ;;  %s728_s9 = int_to_ptr.vmem [resolvable:$true] %s727_s9 }
  0xf3   :  { %901 = vmatprep.mubr.msk.f32.mxu1 %vm54_vm0, %v256_v5  ;;  %s976_s10 = scalar_lea.vmem %s728_s9, 256  ;;  %p981_p1 = scmp.lt.s32.totalorder %s728_s9, %s728_s9 }
  0xf4   :  { %p977_p0 = scmp.ne.s32.totalorder %s728_s9, %s976_s10  ;;  %p982_p2 = scmp.lt.s32.totalorder %s976_s10, %s976_s10 }
  0xf6   :  { %902 = vmatmul.mubr.msk.f32.gmra.mrb[16].mxu1 %vm54_vm0, %v257_v7  ;;  %p983_p3 = por %p982_p2, %p981_p1 }
  0xf7   :  { %904 = vmatprep.mubr.msk.f32.mxu1 %vm54_vm0, %v258_v9 }
  0xf8   :  { %p984_p4 = pnand %p983_p3, %p977_p0 }
  0xfa   :  { %905 = vmatmul.mubr.msk.f32.gmra.mrb[18].mxu1 %vm54_vm0, %v259_v11 }
  0xfb   :  { %907 = vmatprep.mubr.msk.f32.mxu1 %vm54_vm0, %v260_v13 }
  0xfe   :  { %908 = vmatmul.mubr.msk.f32.gmra.mrb[20].mxu1 %vm54_vm0, %v261_v15 }
  0xff   :  { %910 = vmatprep.mubr.msk.f32.mxu1 %vm54_vm0, %v262_v17 }
 0x102   :  { %911 = vmatmul.mubr.msk.f32.gmra.mrb[22].mxu1 %vm54_vm0, %v263_v18 }
 0x1b9   :  { %v891_v20 = vpop.f32.mrb[8].mxu1 }
 0x1ba   :  { %v395_v21 = vadd.f32 %v891_v20, %v755_v19  ;;  %v389_v22 = vpop.f32.mrb[9].mxu1 }
 0x1bb   :  { %v390_v23 = vadd.f32 %v755_v19, %v389_v22 }
 0x1bc   :  { %v469_v26 = vmax.f32 %v395_v21, 0.0 }
 0x1bd   :  { %v468_v24 = vmax.f32 %v390_v23, 0.0  ;;  %v894_v25 = vpop.f32.mrb[10].mxu1 }
 0x1be   :  { %v405_v27 = vadd.f32 %v894_v25, %v755_v19  ;;  %v399_v28 = vpop.f32.mrb[11].mxu1 }
 0x1bf   :  { %v400_v29 = vadd.f32 %v755_v19, %v399_v28  ;;  %921 = vmatprep.mubr.msk.f32.mxu0 %vm54_vm0, %v468_v24 }
 0x1c0   :  { %v471_v30 = vmax.f32 %v405_v27, 0.0  ;;  %922 = vmatmul.mubr.msk.f32.vlgmr.msra.gmra.mrb[8].mxu0 %vm54_vm0, %v469_v26 }
 0x1c1   :  { %v470_v31 = vmax.f32 %v400_v29, 0.0  ;;  %v897_v32 = vpop.f32.mrb[12].mxu1 }
 0x1c2   :  { %v415_v33 = vadd.f32 %v897_v32, %v755_v19  ;;  %v409_v34 = vpop.f32.mrb[13].mxu1 }
 0x1c3   :  { %924 = vmatprep.mubr.msk.f32.mxu0 %vm54_vm0, %v470_v31  ;;  %v410_v35 = vadd.f32 %v755_v19, %v409_v34 }
 0x1c4   :  { %v473_v36 = vmax.f32 %v415_v33, 0.0  ;;  %925 = vmatmul.mubr.msk.f32.gmra.mrb[10].mxu0 %vm54_vm0, %v471_v30 }
 0x1c5   :  { %v472_v37 = vmax.f32 %v410_v35, 0.0  ;;  %v900_v38 = vpop.f32.mrb[14].mxu1 }
 0x1c6   :  { %v425_v39 = vadd.f32 %v900_v38, %v755_v19  ;;  %v419_v40 = vpop.f32.mrb[15].mxu1 }
 0x1c7   :  { %927 = vmatprep.mubr.msk.f32.mxu0 %vm54_vm0, %v472_v37  ;;  %v420_v41 = vadd.f32 %v755_v19, %v419_v40 }
 0x1c8   :  { %928 = vmatmul.mubr.msk.f32.gmra.mrb[12].mxu0 %vm54_vm0, %v473_v36  ;;  %v475_v42 = vmax.f32 %v425_v39, 0.0 }
 0x1c9   :  { %v474_v43 = vmax.f32 %v420_v41, 0.0  ;;  %v903_v44 = vpop.f32.mrb[16].mxu1 }
 0x1ca   :  { %v435_v45 = vadd.f32 %v903_v44, %v755_v19  ;;  %v429_v46 = vpop.f32.mrb[17].mxu1 }
 0x1cb   :  { %930 = vmatprep.mubr.msk.f32.mxu0 %vm54_vm0, %v474_v43  ;;  %v430_v47 = vadd.f32 %v755_v19, %v429_v46 }
 0x1cc   :  { %931 = vmatmul.mubr.msk.f32.gmra.mrb[14].mxu0 %vm54_vm0, %v475_v42  ;;  %v477_v48 = vmax.f32 %v435_v45, 0.0 }
 0x1cd   :  { %v476_v49 = vmax.f32 %v430_v47, 0.0  ;;  %v906_v50 = vpop.f32.mrb[18].mxu1 }
 0x1ce   :  { %v445_v51 = vadd.f32 %v906_v50, %v755_v19  ;;  %v439_v52 = vpop.f32.mrb[19].mxu1 }
 0x1cf   :  { %933 = vmatprep.mubr.msk.f32.mxu0 %vm54_vm0, %v476_v49  ;;  %v440_v53 = vadd.f32 %v755_v19, %v439_v52 }
 0x1d0   :  { %934 = vmatmul.mubr.msk.f32.gmra.mrb[16].mxu0 %vm54_vm0, %v477_v48  ;;  %v479_v54 = vmax.f32 %v445_v51, 0.0 }
 0x1d1   :  { %v478_v55 = vmax.f32 %v440_v53, 0.0  ;;  %v909_v56 = vpop.f32.mrb[20].mxu1 }
 0x1d2   :  { %v455_v57 = vadd.f32 %v909_v56, %v755_v19  ;;  %v449_v58 = vpop.f32.mrb[21].mxu1 }
 0x1d3   :  { %936 = vmatprep.mubr.msk.f32.mxu0 %vm54_vm0, %v478_v55  ;;  %v450_v59 = vadd.f32 %v755_v19, %v449_v58 }
 0x1d4   :  { %937 = vmatmul.mubr.msk.f32.gmra.mrb[18].mxu0 %vm54_vm0, %v479_v54  ;;  %v481_v60 = vmax.f32 %v455_v57, 0.0 }
 0x1d5   :  { %v480_v61 = vmax.f32 %v450_v59, 0.0  ;;  %v912_v62 = vpop.f32.mrb[22].mxu1 }
 0x1d6   :  { %v465_v63 = vadd.f32 %v912_v62, %v755_v19  ;;  %v459_v0 = vpop.f32.mrb[23].mxu1 }
 0x1d7   :  { %939 = vmatprep.mubr.msk.f32.mxu0 %vm54_vm0, %v480_v61  ;;  %v460_v1 = vadd.f32 %v755_v19, %v459_v0 }
 0x1d8   :  { %940 = vmatmul.mubr.msk.f32.gmra.mrb[20].mxu0 %vm54_vm0, %v481_v60  ;;  %v483_v2 = vmax.f32 %v465_v63, 0.0 }
 0x1d9   :  { %v482_v3 = vmax.f32 %v460_v1, 0.0 }
 0x1db   :  { %942 = vmatprep.mubr.msk.f32.mxu0 %vm54_vm0, %v482_v3 }
 0x1dc   :  { %943 = vmatmul.mubr.msk.f32.gmra.mrb[22].mxu0 %vm54_vm0, %v483_v2 }
 0x293   :  { %v923_v5 = vpop.f32.mrb[8].mxu0 }
 0x294   :  { %v609_v6 = vpop.f32.mrb[9].mxu0  ;;  %v615_v10 = vadd.f32 %v923_v5, %v772_v4 }
 0x295   :  { %v610_v7 = vadd.f32 %v772_v4, %v609_v6 }
 0x297   :  { %v926_v8 = vpop.f32.mrb[10].mxu0  ;;  %688 = vxpose.xlu0.b32.start [1/16] (narrow) %v610_v7, 16 }
 0x298   :  { %v619_v9 = vpop.f32.mrb[11].mxu0  ;;  %v625_v16 = vadd.f32 %v926_v8, %v772_v4 }
 0x299   :  { %v620_v13 = vadd.f32 %v772_v4, %v619_v9 }
 0x29b   :  { %689 = vxpose.xlu0.b32.cont [2/16] (narrow) %v615_v10, 16  ;;  %v929_v11 = vpop.f32.mrb[12].mxu0 }
 0x29c   :  { %v629_v12 = vpop.f32.mrb[13].mxu0  ;;  %v635_v22 = vadd.f32 %v929_v11, %v772_v4 }
 0x29d   :  { %v630_v19 = vadd.f32 %v772_v4, %v629_v12 }
 0x29f   :  { %690 = vxpose.xlu0.b32.cont [3/16] (narrow) %v620_v13, 16  ;;  %v932_v14 = vpop.f32.mrb[14].mxu0 }
 0x2a0   :  { %v639_v15 = vpop.f32.mrb[15].mxu0  ;;  %v645_v28 = vadd.f32 %v932_v14, %v772_v4 }
 0x2a1   :  { %v640_v25 = vadd.f32 %v772_v4, %v639_v15 }
 0x2a3   :  { %691 = vxpose.xlu0.b32.cont [4/16] (narrow) %v625_v16, 16  ;;  %v935_v17 = vpop.f32.mrb[16].mxu0 }
 0x2a4   :  { %v649_v18 = vpop.f32.mrb[17].mxu0  ;;  %v655_v30 = vadd.f32 %v935_v17, %v772_v4 }
 0x2a5   :  { %v650_v29 = vadd.f32 %v772_v4, %v649_v18 }
 0x2a7   :  { %692 = vxpose.xlu0.b32.cont [5/16] (narrow) %v630_v19, 16  ;;  %v938_v20 = vpop.f32.mrb[18].mxu0 }
 0x2a8   :  { %v659_v21 = vpop.f32.mrb[19].mxu0  ;;  %v665_v32 = vadd.f32 %v938_v20, %v772_v4 }
 0x2a9   :  { %v660_v31 = vadd.f32 %v772_v4, %v659_v21 }
 0x2ab   :  { %693 = vxpose.xlu0.b32.cont [6/16] (narrow) %v635_v22, 16  ;;  %v941_v23 = vpop.f32.mrb[20].mxu0 }
 0x2ac   :  { %v669_v24 = vpop.f32.mrb[21].mxu0  ;;  %v675_v34 = vadd.f32 %v941_v23, %v772_v4 }
 0x2ad   :  { %v670_v33 = vadd.f32 %v772_v4, %v669_v24 }
 0x2af   :  { %694 = vxpose.xlu0.b32.cont [7/16] (narrow) %v640_v25, 16  ;;  %v944_v26 = vpop.f32.mrb[22].mxu0 }
 0x2b0   :  { %v679_v27 = vpop.f32.mrb[23].mxu0  ;;  %v685_v36 = vadd.f32 %v944_v26, %v772_v4 }
 0x2b1   :  { %v680_v35 = vadd.f32 %v772_v4, %v679_v27 }
 0x2b3   :  { %695 = vxpose.xlu0.b32.cont [8/16] (narrow) %v645_v28, 16 }
 0x2b7   :  { %696 = vxpose.xlu0.b32.cont [9/16] (narrow) %v650_v29, 16 }
 0x2bb   :  { %697 = vxpose.xlu0.b32.cont [10/16] (narrow) %v655_v30, 16 }
 0x2bf   :  { %698 = vxpose.xlu0.b32.cont [11/16] (narrow) %v660_v31, 16 }
 0x2c3   :  { %699 = vxpose.xlu0.b32.cont [12/16] (narrow) %v665_v32, 16 }
 0x2c7   :  { %700 = vxpose.xlu0.b32.cont [13/16] (narrow) %v670_v33, 16 }
 0x2cb   :  { %701 = vxpose.xlu0.b32.cont [14/16] (narrow) %v675_v34, 16 }
 0x2cf   :  { %702 = vxpose.xlu0.b32.cont [15/16] (narrow) %v680_v35, 16 }
 0x2d3   :  { %703 = vxpose.xlu0.b32.end [16/16] (narrow) %v685_v36, 16 }
 0x317   :  { %v704_v37 = vpop.trf.xlu0 }
 0x318   :  { %720 = vst [vmem:[#allocation2] sm:$0xff] %v704_v37 }
 0x31b   :  { %v705_v38 = vpop.trf.xlu0 }
 0x31c   :  { %721 = vst [vmem:[#allocation2 + $0x8] sm:$0xff] %v705_v38 }
 0x31d   :  { %987 = shalt.err (!%p984_p4)
}
 0x31e   :  { %s988_s1 = scalar_lea.hbm %s1203_s7, 256 }
 0x31f   :  { %p989_p5 = scmp.ne.s32.totalorder %s1203_s7, %s988_s1  ;;  %p992_p6 = scmp.lt.u32.totalorder %s988_s1, %s1203_s7 }
 0x321   :  { %p994_p7 = pnand %p992_p6, %p989_p5 }
 0x323   :  { %997 = shalt.err (!%p994_p7)
}
 0x324   :  { %s1001_s17 = smov 128   ;;  %s1002_s18 = smov 8  }
 0x325   :  { %733 = dma.vmem_to_hbm [thread:$0]  %s728_s9, 256, %s1203_s7, [#allocation3], %s1001_s17, %s1001_s17, %s1002_s18  }
 0x326   :  { %998 = dma.done.wait [#allocation3], 256  }
 0x327   :  { %999 = vsyncadd [#allocation3], 4294967040 }
 0x328   :  { %737 = vsyncpa [#allocation3], 1 }

</bundles_post_ra>
